<compile_context>
chip_gen: v7x
topology: tpu7x:2x2x1
jax: 0.10.0
libtpu: 0.0.40
codegen_flags: <defaults>
</compile_context>

<pallas_src>
import numpy as np
import jax
import jax.numpy as jnp
from jax.experimental import pallas as pl
from jax.experimental.pallas import tpu as pltpu


# ----------------------------------------------------------------------------
# Tiling helpers
# ----------------------------------------------------------------------------
# Conservative lane-tile targets: per-step double-buffered footprint of every
# kernel stays well under ~10 MiB, which fits the default scoped VMEM limit on
# v5e (16 MiB), v6e (32 MiB) and v7x (32 MiB of 64 MiB physical) without
# touching vmem_limit_bytes, while tiles stay large (>=32K lanes) so the
# ~0.35 us per-grid-step overhead is negligible.
_LANE_TILE = 128 * 1024       # streaming kernels with (1, C, T) blocks
_FLOW_LANE_TILE = 32 * 1024   # flow kernel writes (1, A2*2, T) blocks -> smaller


def _hw_tile(hw, target):
    """Largest multiple of 128 that divides hw and is <= target (else full hw)."""
    if hw <= target or hw % 128 != 0:
        return hw
    t = (min(target, hw) // 128) * 128
    while t > 128 and hw % t != 0:
        t -= 128
    return t if hw % t == 0 else hw


# ----------------------------------------------------------------------------
# Pallas kernels (elementwise / reduction hot paths)
# ----------------------------------------------------------------------------

def _flow_kernel(factor_ref, depth_ref, out_ref):
    # factor_ref: (A2*2, 1) f32 resident VMEM block, rows = [fx0, fy0, fx1, ...]
    # depth_ref:  (1, 1, T).  Net effect of the module (factor = -factor in
    # __init__, then the scaled depth is negated again in get_mask) is
    # flow = depth * (x_factor, y_factor).  One broadcasted multiply emits the
    # whole (A2*2, T) slab -> full-sublane, unmasked stores, no per-view grid.
    out_ref[0] = factor_ref[...] * depth_ref[0]


def flow_from_depth(depth, factor, angular):
    # depth: (N, 1, H, W), factor: (A2, 2)  ->  flows (N*A2, 2, H, W)
    N, _, H, W = depth.shape
    A2 = angular * angular
    HW = H * W
    T = _hw_tile(HW, _FLOW_LANE_TILE)
    depth2d = depth.reshape(N, 1, HW).astype(jnp.float32)
    fcol = factor.reshape(A2 * 2, 1).astype(jnp.float32)
    flows = pl.pallas_call(
        _flow_kernel,
        out_shape=jax.ShapeDtypeStruct((N, A2 * 2, HW), jnp.float32),
        grid=(N, HW // T),
        in_specs=[
            pl.BlockSpec((A2 * 2, 1), lambda n, t: (0, 0)),
            pl.BlockSpec((1, 1, T), lambda n, t: (n, 0, t)),
        ],
        out_specs=pl.BlockSpec((1, A2 * 2, T), lambda n, t: (n, 0, t)),
        compiler_params=pltpu.CompilerParams(
            dimension_semantics=("parallel", "parallel")),
    )(fcol, depth2d)
    return flows.reshape(N * A2, 2, H, W)


def _occ_mask_kernel(warp_ref, out_ref):
    w = warp_ref[0]                                   # (C, T) f32
    mx = jnp.max(w, axis=0, keepdims=True)            # (1, T)
    out_ref[0] = (mx == 0.0).astype(out_ref.dtype)    # 1.0 where no splat hit


def occlusion_mask(warped_lf):
    # warped_lf: (V, C, H, W) -> slim hole mask (V, 1, H, W) bf16 {0,1}
    # (no channel broadcast; consumers broadcast internally).
    V, C, H, W = warped_lf.shape
    HW = H * W
    T = _hw_tile(HW, _LANE_TILE)
    mask = pl.pallas_call(
        _occ_mask_kernel,
        out_shape=jax.ShapeDtypeStruct((V, 1, HW), jnp.bfloat16),
        grid=(V, HW // T),
        in_specs=[pl.BlockSpec((1, C, T), lambda v, t: (v, 0, t))],
        out_specs=pl.BlockSpec((1, 1, T), lambda v, t: (v, 0, t)),
        compiler_params=pltpu.CompilerParams(
            dimension_semantics=("parallel", "parallel")),
    )(warped_lf.reshape(V, C, HW).astype(jnp.float32))
    return mask.reshape(V, 1, H, W)


def _weight_kernel(img_ref, bw_ref, out_ref):
    # Fused: channel-mean |image - backwarp| followed by exp(-20 * metric).
    d = jnp.abs(img_ref[0].astype(jnp.float32) - bw_ref[0].astype(jnp.float32))
    m = jnp.mean(d, axis=0, keepdims=True)            # (1, T)
    out_ref[0] = jnp.exp(-20.0 * m)                   # EUP; slot is free here


def l1_exp_weight(image, bwarped):
    # weight = exp(-20 * F.l1_loss(...).mean(1, True)), computed in one pass.
    M, C, H, W = image.shape
    HW = H * W
    T = _hw_tile(HW, _LANE_TILE)
    out = pl.pallas_call(
        _weight_kernel,
        out_shape=jax.ShapeDtypeStruct((M, 1, HW), jnp.float32),
        grid=(M, HW // T),
        in_specs=[pl.BlockSpec((1, C, T), lambda m, t: (m, 0, t))] * 2,
        out_specs=pl.BlockSpec((1, 1, T), lambda m, t: (m, 0, t)),
        compiler_params=pltpu.CompilerParams(
            dimension_semantics=("parallel", "parallel")),
    )(image.reshape(M, C, HW).astype(jnp.bfloat16),
      bwarped.reshape(M, C, HW).astype(jnp.bfloat16))
    return out.reshape(M, 1, H, W)


def _occ_loss_kernel(pred_ref, w1_ref, w2_ref, mask_ref, out_ref,
                     acc_ref, cnt_ref):
    first = (pl.program_id(0) == 0) & (pl.program_id(1) == 0)
    last = ((pl.program_id(0) == pl.num_programs(0) - 1)
            & (pl.program_id(1) == pl.num_programs(1) - 1))

    @pl.when(first)
    def _():
        acc_ref[...] = jnp.zeros_like(acc_ref)
        cnt_ref[...] = jnp.zeros_like(cnt_ref)

    # bf16 streamed inputs, all math / accumulation in f32.
    p = pred_ref[0].astype(jnp.float32)                       # (C, T)
    w1 = w1_ref[0].astype(jnp.float32)
    w2 = w2_ref[0].astype(jnp.float32)
    hole = mask_ref[0].astype(jnp.float32)                    # (1, T) -> bcast C
    nm = hole * (w1 > 0.0).astype(jnp.float32) * (w2 > 0.0).astype(jnp.float32)
    # Per-step VPU-only elementwise accumulation into VMEM scratch; the XLU
    # scalar reduce + SMEM write happen once, on the last grid step.
    acc_ref[...] += nm * (jnp.abs(p - w1) + jnp.abs(p - w2))
    cnt_ref[...] += nm

    @pl.when(last)
    def _():
        out_ref[0] = jnp.sum(acc_ref[...])
        out_ref[1] = jnp.sum(cnt_ref[...])


def occlusion_loss_reduce(pred, w_m1, w_p1, mask_slim):
    # get_loss, loss_type == 'mean':
    #   new_mask = hole_mask & (w_m1>0) & (w_p1>0)        (per channel)
    #   loss = mean(cat(10|pred-w_m1|[nm], 10|pred-w_p1|[nm])) ; 0 if nm empty
    # TODO(synk): for a v7x 2-TC split the accumulator needs per-core partials;
    # kept single-core serial here (independent kernels above are 'parallel').
    M, C, H, W = pred.shape
    HW = H * W
    T = _hw_tile(HW, _LANE_TILE)
    bf = lambda x: x.reshape(M, -1, HW).astype(jnp.bfloat16)
    sums = pl.pallas_call(
        _occ_loss_kernel,
        out_shape=jax.ShapeDtypeStruct((2,), jnp.float32),
        grid=(M, HW // T),
        in_specs=[pl.BlockSpec((1, C, T), lambda m, t: (m, 0, t))] * 3
                 + [pl.BlockSpec((1, 1, T), lambda m, t: (m, 0, t))],
        out_specs=pl.BlockSpec(memory_space=pltpu.MemorySpace.SMEM),
        scratch_shapes=[pltpu.VMEM((C, T), jnp.float32),
                        pltpu.VMEM((C, T), jnp.float32)],
        compiler_params=pltpu.CompilerParams(
            dimension_semantics=("arbitrary", "arbitrary")),
    )(bf(pred), bf(w_m1), bf(w_p1), bf(mask_slim))
    total, count = sums[0], sums[1]
    denom = jnp.maximum(count, 1.0)
    return jnp.where(count > 0.0, 10.0 * total / (2.0 * denom), 0.0)


# ----------------------------------------------------------------------------
# Plain-JAX glue (scatter / gather / flownet stand-in)
# ----------------------------------------------------------------------------

def _splat_sum(inp, flow):
    # TODO(synk): softsplat's data-dependent bilinear scatter-add (CUDA op) has no
    # clean Pallas equivalent; kept as a plain-JAX scatter.
    M, C, H, W = inp.shape
    gy, gx = jnp.meshgrid(jnp.arange(H, dtype=jnp.float32),
                          jnp.arange(W, dtype=jnp.float32), indexing="ij")
    fx = gx[None] + flow[:, 0]
    fy = gy[None] + flow[:, 1]
    x0 = jnp.floor(fx)
    y0 = jnp.floor(fy)

    def scatter(out_flat, xi, yi, w):
        valid = (xi >= 0) & (xi <= W - 1) & (yi >= 0) & (yi <= H - 1)
        xi_c = jnp.clip(xi, 0, W - 1).astype(jnp.int32)
        yi_c = jnp.clip(yi, 0, H - 1).astype(jnp.int32)
        w = jnp.where(valid, w, 0.0)
        vals = (inp * w[:, None]).reshape(M, C, H * W)
        idx = jnp.broadcast_to((yi_c * W + xi_c).reshape(M, 1, H * W),
                               (M, C, H * W))
        return jax.vmap(jax.vmap(lambda o, v, i: o.at[i].add(v)))(out_flat, vals, idx)

    out = jnp.zeros((M, C, H * W), inp.dtype)
    out = scatter(out, x0, y0, (x0 + 1.0 - fx) * (y0 + 1.0 - fy))
    out = scatter(out, x0 + 1.0, y0, (fx - x0) * (y0 + 1.0 - fy))
    out = scatter(out, x0, y0 + 1.0, (x0 + 1.0 - fx) * (fy - y0))
    out = scatter(out, x0 + 1.0, y0 + 1.0, (fx - x0) * (fy - y0))
    return out.reshape(M, C, H, W)


def softsplat_normalized(inp, flow, weight=None):
    # weight=None -> 'average' mode; weight=exp(metric) -> 'softmax' mode.
    M, C, H, W = inp.shape
    if weight is None:
        weight = jnp.ones((M, 1, H, W), inp.dtype)
    stacked = jnp.concatenate([inp * weight, weight], axis=1)
    summed = _splat_sum(stacked, flow)
    norm = summed[:, C:C + 1]
    norm = jnp.where(norm == 0.0, 1.0, norm)
    return summed[:, :C] / norm


def backwarp(ten_input, ten_flow):
    # TODO(synk): bilinear grid_sample gather (zeros padding, align_corners=False)
    # kept in plain JAX; the fused L1+exp weight consumer is a Pallas kernel.
    M, C, H, W = ten_input.shape
    hor = jnp.linspace(-1.0 + 1.0 / W, 1.0 - 1.0 / W, W, dtype=jnp.float32)
    ver = jnp.linspace(-1.0 + 1.0 / H, 1.0 - 1.0 / H, H, dtype=jnp.float32)
    gx = jnp.broadcast_to(hor[None, :], (H, W))
    gy = jnp.broadcast_to(ver[:, None], (H, W))
    nx = gx[None] + ten_flow[:, 0] / ((W - 1.0) / 2.0)
    ny = gy[None] + ten_flow[:, 1] / ((H - 1.0) / 2.0)
    px = ((nx + 1.0) * W - 1.0) / 2.0
    py = ((ny + 1.0) * H - 1.0) / 2.0
    x0 = jnp.floor(px)
    y0 = jnp.floor(py)
    inp_flat = ten_input.reshape(M, C, H * W)

    def gather(xi, yi):
        valid = (xi >= 0) & (xi <= W - 1) & (yi >= 0) & (yi <= H - 1)
        xi_c = jnp.clip(xi, 0, W - 1).astype(jnp.int32)
        yi_c = jnp.clip(yi, 0, H - 1).astype(jnp.int32)
        idx = (yi_c * W + xi_c).reshape(M, H * W)
        vals = jax.vmap(lambda a, i: a[:, i])(inp_flat, idx)
        return vals.reshape(M, C, H, W) * valid[:, None].astype(ten_input.dtype)

    w00 = (x0 + 1.0 - px) * (y0 + 1.0 - py)
    w10 = (px - x0) * (y0 + 1.0 - py)
    w01 = (x0 + 1.0 - px) * (py - y0)
    w11 = (px - x0) * (py - y0)
    return (w00[:, None] * gather(x0, y0)
            + w10[:, None] * gather(x0 + 1.0, y0)
            + w01[:, None] * gather(x0, y0 + 1.0)
            + w11[:, None] * gather(x0 + 1.0, y0 + 1.0))


def raft_flow(image, target):
    # TODO(synk): RAFT optical-flow network (pretrained .pth, 20 recurrent iters)
    # has no Pallas equivalent; replaced by a deterministic smooth synthetic flow
    # so the downstream warp / splat / loss math is exercised faithfully.
    M, _, H, W = image.shape
    yy, xx = jnp.meshgrid(jnp.arange(H, dtype=jnp.float32),
                          jnp.arange(W, dtype=jnp.float32), indexing="ij")
    fx = 0.75 * jnp.sin(2.0 * jnp.pi * xx / W)
    fy = 0.75 * jnp.cos(2.0 * jnp.pi * yy / H)
    flow = jnp.stack([fx, fy])[None]
    return jnp.broadcast_to(flow, (M, 2, H, W)).astype(jnp.float32)


def build_factor(angular):
    xs = np.arange((-1 * angular) // 2 + 1, angular // 2 + 1)
    X, Y = np.meshgrid(xs, xs)
    # Deterministic parameter from __init__ (signs cancel with the negation in
    # get_mask, see _flow_kernel comment).
    return jnp.asarray(np.stack([X, Y], axis=-1).reshape(angular * angular, 2),
                       dtype=jnp.float32)


# ----------------------------------------------------------------------------
# OcclusionLoss.forward
# ----------------------------------------------------------------------------

def occlusion_loss_forward(imgs, depth, pred_lf, *, angular, inds):
    curr_img = imgs[0]
    N, C, H, W = curr_img.shape
    A2 = angular * angular
    factor = build_factor(angular)

    # get_mask: per-view flows (Pallas), 'average' forward splat, slim hole mask
    flows = flow_from_depth(depth, factor, angular)                  # (N*A2, 2, H, W)
    curr_rep = jnp.broadcast_to(curr_img[:, None],
                                (N, A2, C, H, W)).reshape(N * A2, C, H, W)
    forward_warp_lf = softsplat_normalized(curr_rep, flows)
    mask = occlusion_mask(forward_warp_lf)           # (N*A2, 1, H, W), 1.0 = hole

    forward_warp_lf = forward_warp_lf[inds]
    mask = mask[inds]

    warped_lfs = {}
    for frame_id in (-1, 1):
        image = jnp.broadcast_to(imgs[frame_id][:, None],
                                 (N, A2, C, H, W)).reshape(N * A2, C, H, W)[inds]
        flow = raft_flow(image, forward_warp_lf)
        weight = l1_exp_weight(image, backwarp(forward_warp_lf, flow))  # Pallas, fused exp
        warped = softsplat_normalized(image, flow, weight)              # 'softmax' splat
        warped_lfs[frame_id] = jnp.clip(warped, 0.0, 1.0)

    pred = pred_lf.reshape(N * A2, C, H, W)[inds]
    occ_loss = occlusion_loss_reduce(pred, warped_lfs[-1], warped_lfs[1], mask)  # Pallas
    # aux mask returned channel-broadcast (as in the module's repeat(1,1,3,1,1))
    mask_aux = jnp.broadcast_to(mask.astype(jnp.float32),
                                (mask.shape[0], C, H, W))
    return occ_loss, [forward_warp_lf, warped_lfs, mask_aux]


if __name__ == "__main__":
    key = jax.random.PRNGKey(0)
    N, C, H, W = 1, 3, 16, 16
    angular = 3
    ratio = 0.5
    A2 = angular * angular

    k = jax.random.split(key, 6)
    imgs = {
        0:  jax.random.uniform(k[0], (N, C, H, W), jnp.float32),
        -1: jax.random.uniform(k[1], (N, C, H, W), jnp.float32),
        1:  jax.random.uniform(k[2], (N, C, H, W), jnp.float32),
    }
    depth = jax.random.uniform(k[3], (N, 1, H, W), jnp.float32, 0.5, 3.0)
    pred_lf = jax.random.uniform(k[4], (N, A2, C, H, W), jnp.float32)

    # TODO(synk): module uses np.random.random_integers (non-deterministic);
    # replaced with a deterministic jax.random.randint draw of the same size/range.
    num = int(ratio * N * A2)
    inds = jax.random.randint(k[5], (num,), 0, N * A2)

    fwd = jax.jit(occlusion_loss_forward, static_argnames=("angular",))
    loss, aux = fwd(imgs, depth, pred_lf, angular=angular, inds=inds)
    loss = jax.block_until_ready(loss)
    assert bool(jnp.isfinite(loss))
    print("KERNEL_OK")
</pallas_src>

<mosaic_0001>
module attributes {stable_mosaic.version = 11 : i64} {
  func.func private @main(%arg0: i32) attributes {dimension_semantics = [#tpu.dimension_semantics<core_parallel>], iteration_bounds = array<i64: 2>, tpu.core_type = #tpu.core_type<sc_scalar_subcore>, window_params = []} {
    return
  }
}

module attributes {stable_mosaic.version = 11 : i64} {
  func.func private @main(%arg0: i32) attributes {dimension_semantics = [#tpu.dimension_semantics<core_parallel>], iteration_bounds = array<i64: 2>, tpu.core_type = #tpu.core_type<sc_scalar_subcore>, window_params = []} {
    return
  }
}

module attributes {stable_mosaic.version = 11 : i64} {
  func.func @_flow_kernel(%arg0: i32, %arg1: i32, %arg2: memref<18x1xf32, #tpu.memory_space<vmem>>, %arg3: memref<1x1x256xf32, #tpu.memory_space<vmem>>, %arg4: memref<1x18x256xf32, #tpu.memory_space<vmem>>) attributes {dimension_semantics = [#tpu.dimension_semantics<parallel>, #tpu.dimension_semantics<parallel>], iteration_bounds = array<i64: 1, 1>, scalar_prefetch = 0 : i64, scratch_operands = 0 : i64, tpu.core_type = #tpu.core_type<tc>, window_params = [{pipeline_mode = #tpu.pipeline_mode<synchronous>, transform_indices = @transform_0, window_bounds = array<i64: 18, 1>}, {transform_indices = @transform_1, window_bounds = array<i64: 1, 1, 256>}, {transform_indices = @transform_2, window_bounds = array<i64: 1, 18, 256>}]} {
    %c0 = arith.constant 0 : index
    %c0_0 = arith.constant 0 : index
    %0 = vector.load %arg2[%c0, %c0_0] : memref<18x1xf32, #tpu.memory_space<vmem>>, vector<18x1xf32>
    %c0_1 = arith.constant 0 : index
    %c0_2 = arith.constant 0 : index
    %c0_3 = arith.constant 0 : index
    %1 = vector.load %arg3[%c0_1, %c0_2, %c0_3] : memref<1x1x256xf32, #tpu.memory_space<vmem>>, vector<1x1x256xf32>
    %2 = vector.shape_cast %1 : vector<1x1x256xf32> to vector<1x256xf32>
    %3 = vector.broadcast %0 : vector<18x1xf32> to vector<18x256xf32>
    %4 = vector.broadcast %2 : vector<1x256xf32> to vector<18x256xf32>
    %5 = arith.mulf %3, %4 : vector<18x256xf32>
    %c0_4 = arith.constant 0 : index
    %c0_5 = arith.constant 0 : index
    %c0_6 = arith.constant 0 : index
    %6 = vector.load %arg4[%c0_4, %c0_5, %c0_6] : memref<1x18x256xf32, #tpu.memory_space<vmem>>, vector<1x18x256xf32>
    %7 = vector.shape_cast %6 : vector<1x18x256xf32> to vector<18x256xf32>
    %8 = vector.shape_cast %5 : vector<18x256xf32> to vector<1x18x256xf32>
    tpu.vector_store %arg4[%c0_4, %c0_5, %c0_6], %8 {strides = array<i32>} : memref<1x18x256xf32, #tpu.memory_space<vmem>>, vector<1x18x256xf32>,
    return
  }
  func.func @transform_0(%arg0: i32, %arg1: i32) -> (i32, i32) {
    %c0_i32 = arith.constant 0 : i32
    %c0_i32_0 = arith.constant 0 : i32
    %c0_i32_1 = arith.constant 0 : i32
    return %c0_i32, %c0_i32_0 : i32, i32
  }
  func.func @transform_1(%arg0: i32, %arg1: i32) -> (i32, i32, i32) {
    %c0_i32 = arith.constant 0 : i32
    %c0_i32_0 = arith.constant 0 : i32
    return %arg0, %c0_i32, %arg1 : i32, i32, i32
  }
  func.func @transform_2(%arg0: i32, %arg1: i32) -> (i32, i32, i32) {
    %c0_i32 = arith.constant 0 : i32
    %c0_i32_0 = arith.constant 0 : i32
    return %arg0, %c0_i32, %arg1 : i32, i32, i32
  }
}

module attributes {stable_mosaic.version = 11 : i64} {
  func.func @_weight_kernel(%arg0: i32, %arg1: i32, %arg2: memref<1x3x256xbf16, #tpu.memory_space<vmem>>, %arg3: memref<1x3x256xbf16, #tpu.memory_space<vmem>>, %arg4: memref<1x1x256xf32, #tpu.memory_space<vmem>>) attributes {dimension_semantics = [#tpu.dimension_semantics<parallel>, #tpu.dimension_semantics<parallel>], iteration_bounds = array<i64: 4, 1>, scalar_prefetch = 0 : i64, scratch_operands = 0 : i64, tpu.core_type = #tpu.core_type<tc>, window_params = [{transform_indices = @transform_0, window_bounds = array<i64: 1, 3, 256>}, {transform_indices = @transform_1, window_bounds = array<i64: 1, 3, 256>}, {transform_indices = @transform_2, window_bounds = array<i64: 1, 1, 256>}]} {
    %c0 = arith.constant 0 : index
    %c0_0 = arith.constant 0 : index
    %c0_1 = arith.constant 0 : index
    %0 = vector.load %arg2[%c0, %c0_0, %c0_1] : memref<1x3x256xbf16, #tpu.memory_space<vmem>>, vector<1x3x256xbf16>
    %1 = vector.shape_cast %0 : vector<1x3x256xbf16> to vector<3x256xbf16>
    %2 = arith.extf %1 : vector<3x256xbf16> to vector<3x256xf32>
    %c0_2 = arith.constant 0 : index
    %c0_3 = arith.constant 0 : index
    %c0_4 = arith.constant 0 : index
    %3 = vector.load %arg3[%c0_2, %c0_3, %c0_4] : memref<1x3x256xbf16, #tpu.memory_space<vmem>>, vector<1x3x256xbf16>
    %4 = vector.shape_cast %3 : vector<1x3x256xbf16> to vector<3x256xbf16>
    %5 = arith.extf %4 : vector<3x256xbf16> to vector<3x256xf32>
    %6 = arith.subf %2, %5 : vector<3x256xf32>
    %7 = math.absf %6 : vector<3x256xf32>
    %cst = arith.constant dense<0.000000e+00> : vector<256xf32>
    %8 = vector.multi_reduction <add>, %7, %cst [0] : vector<3x256xf32> to vector<256xf32>
    %9 = vector.shape_cast %8 : vector<256xf32> to vector<1x256xf32>
    %cst_5 = arith.constant 3.000000e+00 : f32
    %10 = vector.broadcast %cst_5 : f32 to vector<1x256xf32>
    %11 = arith.divf %9, %10 : vector<1x256xf32>
    %cst_6 = arith.constant -2.000000e+01 : f32
    %12 = vector.broadcast %cst_6 : f32 to vector<1x256xf32>
    %13 = arith.mulf %12, %11 : vector<1x256xf32>
    %14 = math.exp %13 : vector<1x256xf32>
    %c0_7 = arith.constant 0 : index
    %c0_8 = arith.constant 0 : index
    %c0_9 = arith.constant 0 : index
    %15 = vector.load %arg4[%c0_7, %c0_8, %c0_9] : memref<1x1x256xf32, #tpu.memory_space<vmem>>, vector<1x1x256xf32>
    %16 = vector.shape_cast %15 : vector<1x1x256xf32> to vector<1x256xf32>
    %17 = vector.shape_cast %14 : vector<1x256xf32> to vector<1x1x256xf32>
    tpu.vector_store %arg4[%c0_7, %c0_8, %c0_9], %17 {strides = array<i32>} : memref<1x1x256xf32, #tpu.memory_space<vmem>>, vector<1x1x256xf32>,
    return
  }
  func.func @transform_0(%arg0: i32, %arg1: i32) -> (i32, i32, i32) {
    %c0_i32 = arith.constant 0 : i32
    %c0_i32_0 = arith.constant 0 : i32
    return %arg0, %c0_i32, %arg1 : i32, i32, i32
  }
  func.func @transform_1(%arg0: i32, %arg1: i32) -> (i32, i32, i32) {
    %c0_i32 = arith.constant 0 : i32
    %c0_i32_0 = arith.constant 0 : i32
    return %arg0, %c0_i32, %arg1 : i32, i32, i32
  }
  func.func @transform_2(%arg0: i32, %arg1: i32) -> (i32, i32, i32) {
    %c0_i32 = arith.constant 0 : i32
    %c0_i32_0 = arith.constant 0 : i32
    return %arg0, %c0_i32, %arg1 : i32, i32, i32
  }
}

module attributes {stable_mosaic.version = 11 : i64} {
  func.func @_occ_mask_kernel(%arg0: i32, %arg1: i32, %arg2: memref<1x3x256xf32, #tpu.memory_space<vmem>>, %arg3: memref<1x1x256xbf16, #tpu.memory_space<vmem>>) attributes {dimension_semantics = [#tpu.dimension_semantics<parallel>, #tpu.dimension_semantics<parallel>], iteration_bounds = array<i64: 9, 1>, scalar_prefetch = 0 : i64, scratch_operands = 0 : i64, tpu.core_type = #tpu.core_type<tc>, window_params = [{transform_indices = @transform_0, window_bounds = array<i64: 1, 3, 256>}, {transform_indices = @transform_1, window_bounds = array<i64: 1, 1, 256>}]} {
    %c0 = arith.constant 0 : index
    %c0_0 = arith.constant 0 : index
    %c0_1 = arith.constant 0 : index
    %0 = vector.load %arg2[%c0, %c0_0, %c0_1] : memref<1x3x256xf32, #tpu.memory_space<vmem>>, vector<1x3x256xf32>
    %1 = vector.shape_cast %0 : vector<1x3x256xf32> to vector<3x256xf32>
    %cst = arith.constant dense<0xFF800000> : vector<256xf32>
    %2 = vector.multi_reduction <maximumf>, %1, %cst [0] : vector<3x256xf32> to vector<256xf32>
    %3 = vector.shape_cast %2 : vector<256xf32> to vector<1x256xf32>
    %cst_2 = arith.constant 0.000000e+00 : f32
    %4 = vector.broadcast %cst_2 : f32 to vector<1x256xf32>
    %5 = arith.cmpf oeq, %3, %4 : vector<1x256xf32>
    %6 = arith.extui %5 : vector<1x256xi1> to vector<1x256xi32>
    %7 = arith.sitofp %6 : vector<1x256xi32> to vector<1x256xf32>
    %8 = arith.truncf %7 : vector<1x256xf32> to vector<1x256xbf16>
    %c0_3 = arith.constant 0 : index
    %c0_4 = arith.constant 0 : index
    %c0_5 = arith.constant 0 : index
    %9 = vector.load %arg3[%c0_3, %c0_4, %c0_5] : memref<1x1x256xbf16, #tpu.memory_space<vmem>>, vector<1x1x256xbf16>
    %10 = vector.shape_cast %9 : vector<1x1x256xbf16> to vector<1x256xbf16>
    %11 = vector.shape_cast %8 : vector<1x256xbf16> to vector<1x1x256xbf16>
    tpu.vector_store %arg3[%c0_3, %c0_4, %c0_5], %11 {strides = array<i32>} : memref<1x1x256xbf16, #tpu.memory_space<vmem>>, vector<1x1x256xbf16>,
    return
  }
  func.func @transform_0(%arg0: i32, %arg1: i32) -> (i32, i32, i32) {
    %c0_i32 = arith.constant 0 : i32
    %c0_i32_0 = arith.constant 0 : i32
    return %arg0, %c0_i32, %arg1 : i32, i32, i32
  }
  func.func @transform_1(%arg0: i32, %arg1: i32) -> (i32, i32, i32) {
    %c0_i32 = arith.constant 0 : i32
    %c0_i32_0 = arith.constant 0 : i32
    return %arg0, %c0_i32, %arg1 : i32, i32, i32
  }
}

module attributes {stable_mosaic.version = 11 : i64} {
  func.func @_occ_loss_kernel(%arg0: i32, %arg1: i32, %arg2: memref<1x3x256xbf16, #tpu.memory_space<vmem>>, %arg3: memref<1x3x256xbf16, #tpu.memory_space<vmem>>, %arg4: memref<1x3x256xbf16, #tpu.memory_space<vmem>>, %arg5: memref<1x1x256xbf16, #tpu.memory_space<vmem>>, %arg6: memref<2xf32, #tpu.memory_space<smem>>, %arg7: memref<3x256xf32, #tpu.memory_space<vmem>>, %arg8: memref<3x256xf32, #tpu.memory_space<vmem>>) attributes {dimension_semantics = [#tpu.dimension_semantics<arbitrary>, #tpu.dimension_semantics<arbitrary>], iteration_bounds = array<i64: 4, 1>, scalar_prefetch = 0 : i64, scratch_operands = 2 : i64, tpu.core_type = #tpu.core_type<tc>, window_params = [{transform_indices = @transform_0, window_bounds = array<i64: 1, 3, 256>}, {transform_indices = @transform_1, window_bounds = array<i64: 1, 3, 256>}, {transform_indices = @transform_2, window_bounds = array<i64: 1, 3, 256>}, {transform_indices = @transform_3, window_bounds = array<i64: 1, 1, 256>}, {transform_indices = @transform_4, window_bounds = array<i64: 2>}]} {
    %c0_i32 = arith.constant 0 : i32
    %0 = arith.cmpi eq, %arg0, %c0_i32 : i32
    %c0_i32_0 = arith.constant 0 : i32
    %1 = arith.cmpi eq, %arg1, %c0_i32_0 : i32
    %2 = arith.andi %0, %1 : i1
    %c3_i32 = arith.constant 3 : i32
    %3 = arith.cmpi eq, %arg0, %c3_i32 : i32
    %c0_i32_1 = arith.constant 0 : i32
    %4 = arith.cmpi eq, %arg1, %c0_i32_1 : i32
    %5 = arith.andi %3, %4 : i1
    %6 = arith.extui %2 : i1 to i32
    %c0_i32_2 = arith.constant 0 : i32
    %7 = arith.cmpi ne, %6, %c0_i32_2 : i32
    scf.if %7 {
      %cst_24 = arith.constant 0.000000e+00 : f32
      %45 = vector.broadcast %cst_24 : f32 to vector<3x256xf32>
      %c0_25 = arith.constant 0 : index
      %c0_26 = arith.constant 0 : index
      %46 = vector.load %arg7[%c0_25, %c0_26] : memref<3x256xf32, #tpu.memory_space<vmem>>, vector<3x256xf32>
      tpu.vector_store %arg7[%c0_25, %c0_26], %45 {strides = array<i32>} : memref<3x256xf32, #tpu.memory_space<vmem>>, vector<3x256xf32>,
      %cst_27 = arith.constant 0.000000e+00 : f32
      %47 = vector.broadcast %cst_27 : f32 to vector<3x256xf32>
      %c0_28 = arith.constant 0 : index
      %c0_29 = arith.constant 0 : index
      %48 = vector.load %arg8[%c0_28, %c0_29] : memref<3x256xf32, #tpu.memory_space<vmem>>, vector<3x256xf32>
      tpu.vector_store %arg8[%c0_28, %c0_29], %47 {strides = array<i32>} : memref<3x256xf32, #tpu.memory_space<vmem>>, vector<3x256xf32>,
    } else {
    }
    %c0 = arith.constant 0 : index
    %c0_3 = arith.constant 0 : index
    %c0_4 = arith.constant 0 : index
    %8 = vector.load %arg2[%c0, %c0_3, %c0_4] : memref<1x3x256xbf16, #tpu.memory_space<vmem>>, vector<1x3x256xbf16>
    %9 = vector.shape_cast %8 : vector<1x3x256xbf16> to vector<3x256xbf16>
    %10 = arith.extf %9 : vector<3x256xbf16> to vector<3x256xf32>
    %c0_5 = arith.constant 0 : index
    %c0_6 = arith.constant 0 : index
    %c0_7 = arith.constant 0 : index
    %11 = vector.load %arg3[%c0_5, %c0_6, %c0_7] : memref<1x3x256xbf16, #tpu.memory_space<vmem>>, vector<1x3x256xbf16>
    %12 = vector.shape_cast %11 : vector<1x3x256xbf16> to vector<3x256xbf16>
    %13 = arith.extf %12 : vector<3x256xbf16> to vector<3x256xf32>
    %c0_8 = arith.constant 0 : index
    %c0_9 = arith.constant 0 : index
    %c0_10 = arith.constant 0 : index
    %14 = vector.load %arg4[%c0_8, %c0_9, %c0_10] : memref<1x3x256xbf16, #tpu.memory_space<vmem>>, vector<1x3x256xbf16>
    %15 = vector.shape_cast %14 : vector<1x3x256xbf16> to vector<3x256xbf16>
    %16 = arith.extf %15 : vector<3x256xbf16> to vector<3x256xf32>
    %c0_11 = arith.constant 0 : index
    %c0_12 = arith.constant 0 : index
    %c0_13 = arith.constant 0 : index
    %17 = vector.load %arg5[%c0_11, %c0_12, %c0_13] : memref<1x1x256xbf16, #tpu.memory_space<vmem>>, vector<1x1x256xbf16>
    %18 = vector.shape_cast %17 : vector<1x1x256xbf16> to vector<1x256xbf16>
    %19 = arith.extf %18 : vector<1x256xbf16> to vector<1x256xf32>
    %cst = arith.constant 0.000000e+00 : f32
    %20 = vector.broadcast %cst : f32 to vector<3x256xf32>
    %21 = arith.cmpf ogt, %13, %20 : vector<3x256xf32>
    %22 = arith.extui %21 : vector<3x256xi1> to vector<3x256xi32>
    %23 = arith.sitofp %22 : vector<3x256xi32> to vector<3x256xf32>
    %24 = vector.broadcast %19 : vector<1x256xf32> to vector<3x256xf32>
    %25 = arith.mulf %24, %23 : vector<3x256xf32>
    %cst_14 = arith.constant 0.000000e+00 : f32
    %26 = vector.broadcast %cst_14 : f32 to vector<3x256xf32>
    %27 = arith.cmpf ogt, %16, %26 : vector<3x256xf32>
    %28 = arith.extui %27 : vector<3x256xi1> to vector<3x256xi32>
    %29 = arith.sitofp %28 : vector<3x256xi32> to vector<3x256xf32>
    %30 = arith.mulf %25, %29 : vector<3x256xf32>
    %c0_15 = arith.constant 0 : index
    %c0_16 = arith.constant 0 : index
    %31 = vector.load %arg7[%c0_15, %c0_16] : memref<3x256xf32, #tpu.memory_space<vmem>>, vector<3x256xf32>
    %32 = arith.subf %10, %13 : vector<3x256xf32>
    %33 = math.absf %32 : vector<3x256xf32>
    %34 = arith.subf %10, %16 : vector<3x256xf32>
    %35 = math.absf %34 : vector<3x256xf32>
    %36 = arith.addf %33, %35 : vector<3x256xf32>
    %37 = arith.mulf %30, %36 : vector<3x256xf32>
    %38 = arith.addf %31, %37 : vector<3x256xf32>
    %c0_17 = arith.constant 0 : index
    %c0_18 = arith.constant 0 : index
    %39 = vector.load %arg7[%c0_17, %c0_18] : memref<3x256xf32, #tpu.memory_space<vmem>>, vector<3x256xf32>
    tpu.vector_store %arg7[%c0_17, %c0_18], %38 {strides = array<i32>} : memref<3x256xf32, #tpu.memory_space<vmem>>, vector<3x256xf32>,
    %c0_19 = arith.constant 0 : index
    %c0_20 = arith.constant 0 : index
    %40 = vector.load %arg8[%c0_19, %c0_20] : memref<3x256xf32, #tpu.memory_space<vmem>>, vector<3x256xf32>
    %41 = arith.addf %40, %30 : vector<3x256xf32>
    %c0_21 = arith.constant 0 : index
    %c0_22 = arith.constant 0 : index
    %42 = vector.load %arg8[%c0_21, %c0_22] : memref<3x256xf32, #tpu.memory_space<vmem>>, vector<3x256xf32>
    tpu.vector_store %arg8[%c0_21, %c0_22], %41 {strides = array<i32>} : memref<3x256xf32, #tpu.memory_space<vmem>>, vector<3x256xf32>,
    %43 = arith.extui %5 : i1 to i32
    %c0_i32_23 = arith.constant 0 : i32
    %44 = arith.cmpi ne, %43, %c0_i32_23 : i32
    scf.if %44 {
      %c0_24 = arith.constant 0 : index
      %c0_25 = arith.constant 0 : index
      %45 = vector.load %arg7[%c0_24, %c0_25] : memref<3x256xf32, #tpu.memory_space<vmem>>, vector<3x256xf32>
      %46 = vector.shape_cast %45 : vector<3x256xf32> to vector<1x3x256xf32>
      %cst_26 = arith.constant dense<0.000000e+00> : vector<1xf32>
      %47 = vector.multi_reduction <add>, %46, %cst_26 [1, 2] : vector<1x3x256xf32> to vector<1xf32>
      %48 = vector.shape_cast %47 : vector<1xf32> to vector<1x1x1xf32>
      %49 = vector.extract %48[0, 0, 0] : f32 from vector<1x1x1xf32>
      %c0_27 = arith.constant 0 : index
      %50 = memref.load %arg6[%c0_27] : memref<2xf32, #tpu.memory_space<smem>>
      memref.store %49, %arg6[%c0_27] : memref<2xf32, #tpu.memory_space<smem>>
      %c0_28 = arith.constant 0 : index
      %c0_29 = arith.constant 0 : index
      %51 = vector.load %arg8[%c0_28, %c0_29] : memref<3x256xf32, #tpu.memory_space<vmem>>, vector<3x256xf32>
      %52 = vector.shape_cast %51 : vector<3x256xf32> to vector<1x3x256xf32>
      %cst_30 = arith.constant dense<0.000000e+00> : vector<1xf32>
      %53 = vector.multi_reduction <add>, %52, %cst_30 [1, 2] : vector<1x3x256xf32> to vector<1xf32>
      %54 = vector.shape_cast %53 : vector<1xf32> to vector<1x1x1xf32>
      %55 = vector.extract %54[0, 0, 0] : f32 from vector<1x1x1xf32>
      %c1 = arith.constant 1 : index
      %56 = memref.load %arg6[%c1] : memref<2xf32, #tpu.memory_space<smem>>
      memref.store %55, %arg6[%c1] : memref<2xf32, #tpu.memory_space<smem>>
    } else {
    }
    return
  }
  func.func @transform_0(%arg0: i32, %arg1: i32) -> (i32, i32, i32) {
    %c0_i32 = arith.constant 0 : i32
    %c0_i32_0 = arith.constant 0 : i32
    return %arg0, %c0_i32, %arg1 : i32, i32, i32
  }
  func.func @transform_1(%arg0: i32, %arg1: i32) -> (i32, i32, i32) {
    %c0_i32 = arith.constant 0 : i32
    %c0_i32_0 = arith.constant 0 : i32
    return %arg0, %c0_i32, %arg1 : i32, i32, i32
  }
  func.func @transform_2(%arg0: i32, %arg1: i32) -> (i32, i32, i32) {
    %c0_i32 = arith.constant 0 : i32
    %c0_i32_0 = arith.constant 0 : i32
    return %arg0, %c0_i32, %arg1 : i32, i32, i32
  }
  func.func @transform_3(%arg0: i32, %arg1: i32) -> (i32, i32, i32) {
    %c0_i32 = arith.constant 0 : i32
    %c0_i32_0 = arith.constant 0 : i32
    return %arg0, %c0_i32, %arg1 : i32, i32, i32
  }
  func.func @transform_4(%arg0: i32, %arg1: i32) -> i32 {
    %c0_i32 = arith.constant 0 : i32
    %c0_i32_0 = arith.constant 0 : i32
    return %c0_i32 : i32
  }
}

</mosaic_0001>

<bundles_post_ra>
// kernel: occlusion_loss_forward.5
= control target key start
LH: loop header
LB: loop body
LE: loop exit
PB: predicated region body
PF: predicated region fallthrough
CT: control target
= control target key end

     0   :  { %v60_v0 = vmov 0   ;;  %v31_v4 = vlaneseq  ;;  %s106_s0 = inlined_call_operand.vmem [shape: f32[18,1], index: 0, kind: input, shape index: {}]   ;;  %s107_s1 = inlined_call_operand.vmem [shape: f32[1,1,256], index: 1, kind: input, shape index: {}]   ;;  %s108_s2 = inlined_call_operand.vmem [shape: f32[1,18,256], index: 2, kind: output, shape index: {}]  }
   0x1   :  { %58 = vset.pattern.permute.xlu0 %v60_v0  ;;  %v11_v1 = vld [vmem:[%s106_s0] sm:$0xff]  ;;  %59 = vset.pattern.permute.xlu1 %v60_v0  ;;  %v13_v2 = vld [vmem:[%s106_s0 + $0x10] sm:$0x3]  ;;  %v12_v3 = vld [vmem:[%s106_s0 + $0x8] sm:$0xff] }
   0x2   :  { %17 = vperm.xlu0 %58, %v11_v1   ;;  %27 = vperm.xlu1 %59, %v13_v2   ;;  %v32_v5 = vshrl.u32 %v31_v4, 7  ;;  %v14_v8 = vld [vmem:[%s107_s1] sm:$0x3] }
   0x4   :  { %v33_v6 = vsub.s32 0, %v32_v5  ;;  %v37_v7 = vsub.s32 1, %v32_v5 }
   0x6   :  { %22 = vperm.xlu0 %58, %v12_v3   ;;  %v34_v9 = vrot.slane %v14_v8, %v33_v6  ;;  %v38_v10 = vrot.slane %v14_v8, %v37_v7 }
  0x81   :  { %v18_v11 = vpop.permute.xlu0 %17  ;;  %v28_v12 = vpop.permute.xlu1 %27 }
  0x82   :  { %v41_v13 = vmul.f32 %v34_v9, %v18_v11  ;;  %v42_v14 = vmul.f32 %v38_v10, %v18_v11  ;;  %v45_v15 = vmul.f32 %v34_v9, %v28_v12  ;;  %v46_v16 = vmul.f32 %v38_v10, %v28_v12 }
  0x84   :  { %47 = vst [vmem:[%s108_s2] sm:$0xff] %v41_v13  ;;  %48 = vst [vmem:[%s108_s2 + $0x8] sm:$0xff] %v42_v14 }
  0x85   :  { %51 = vst [vmem:[%s108_s2 + $0x20] sm:$0x3] %v45_v15  ;;  %52 = vst [vmem:[%s108_s2 + $0x28] sm:$0x3] %v46_v16  ;;  %v23_v17 = vpop.permute.xlu0 %22 }
  0x86   :  { %v43_v18 = vmul.f32 %v34_v9, %v23_v17  ;;  %v44_v19 = vmul.f32 %v38_v10, %v23_v17 }
  0x88   :  { %49 = vst [vmem:[%s108_s2 + $0x10] sm:$0xff] %v43_v18  ;;  %50 = vst [vmem:[%s108_s2 + $0x18] sm:$0xff] %v44_v19 }

// kernel: occlusion_loss_forward.8
= control target key start
LH: loop header
LB: loop body
LE: loop exit
PB: predicated region body
PF: predicated region fallthrough
CT: control target
= control target key end

     0   :  { %s455_s9 = smov 0   ;;  %s457_s10 = smov 0   ;;  %s495_s0 = inlined_call_operand.vmem [shape: bf16[4,3,256], index: 0, kind: input, shape index: {}]   ;;  %s496_s1 = inlined_call_operand.vmem [shape: bf16[4,3,256], index: 1, kind: input, shape index: {}]   ;;  %s497_s2 = inlined_call_operand.vmem [shape: f32[4,1,256], index: 2, kind: output, shape index: {}]  }
   0x1   :  { %s459_s11 = smov 0  }
   0x2 LB: > { %s24_s12 = sadd.s32 1, %s433_s10  ;;  %p376_p0 = scmp.ge.s32.totalorder %s437_s11, 1  ;;  %s437_s11 = sphi %s459_s11, %s12_s11   ;;  %s433_s10 = sphi %s457_s10, %s499_s10   ;;  %s429_s9 = sphi %s455_s9, %s498_s9  }
   0x3   : > { %p26_p1 = scmp.ge.s32.totalorder %s24_s12, 4  ;;  %p150_p2 = scmp.lt.s32.totalorder %s437_s11, 5 }
   0x5   : > { %s501_s12 = smov (%p26_p1, %s24_s12), 0  ;;  %p151_p3 = pnand %p376_p0, %p150_p2 }
   0x6   : > { %p189_p4 = scmp.lt.s32.totalorder (!%p151_p3), %s429_s9, 3  ;;  %vm226_vm0 = vcmask (!%p151_p3), 1042432   ;;  %v439_v27 = vmov (!%p151_p3), 1966171168   ;;  %v256_v29 = vlaneseq (!%p151_p3) }
   0x7   : > { %154 = sbr.rel (%p151_p3) target bundleno = 64 (0x40), region = 28  ;;  %v254_v28 = vunpack.c.l.s4 (!%p151_p3), %v439_v27 }
   0x8   : > { %v257_v31 = vshrl.u32 (!%p151_p3), %v256_v29, 7  ;;  %vm270_vm1 = vcmp.lt.s32.totalorder (!%p151_p3), %v256_v29, 256 }
   0x9   : > { %v255_v30 = vunpack.c.0.s8 (!%p151_p3), %v254_v28 }
   0xb   : > { %v258_v33 = vsub.s32 (!%p151_p3), %v255_v30, %v257_v31 }
   0xe   : > { %s503_s9 = smov (!%p189_p4, %s429_s9), 3 }
   0xf   : > { %s384_s13 = sshll.u32 %s503_s9, 2  ;;  %s381_s20 = sshll.u32 %s503_s9, 1 }
  0x10   : > { %s196_s16 = scalar_lea.vmem %s495_s0, %s384_s13  ;;  %s206_s19 = scalar_lea.vmem %s496_s1, %s384_s13 }
  0x11   : > { %v217_v0 = vld [vmem:[%s196_s16] sm:$0xf]  ;;  %s215_s23 = scalar_lea.vmem %s497_s2, %s381_s20 }
  0x12   : > { %v219_v1 = vld [vmem:[%s206_s19] sm:$0xf]  ;;  %v218_v2 = vunpack.c.l.bf16 %v217_v0 }
  0x13   : > { %v220_v3 = vunpack.c.l.bf16 %v219_v1 }
  0x15   : > { %v221_v4 = vsub.f32 %v218_v2, %v220_v3 }
  0x17   : > { %v222_v5 = vand.u32 2147483647, %v221_v4 }
  0x19   : > { %v224_v6 = vcombine.high %v222_v5, %v222_v5  ;;  %v227_v7 = vsel %vm226_vm0, %v222_v5, 0.0 }
  0x1a   : > { %v228_v8 = vrot.slane %v227_v7, 4 }
  0x1b   : > { %v234_v9 = vsel %vm226_vm0, %v224_v6, 0.0 }
  0x1c   : > { %v229_v10 = vadd.f32 %v228_v8, %v227_v7  ;;  %v235_v11 = vrot.slane %v234_v9, 4 }
  0x1e   : > { %v230_v12 = vrot.slane %v229_v10, 2  ;;  %v236_v13 = vadd.f32 %v235_v11, %v234_v9 }
  0x20   : > { %v231_v14 = vadd.f32 %v230_v12, %v229_v10  ;;  %v237_v15 = vrot.slane %v236_v13, 2 }
  0x22   : > { %v232_v16 = vrot.slane %v231_v14, 1  ;;  %v238_v17 = vadd.f32 %v237_v15, %v236_v13 }
  0x24   : > { %v233_v18 = vadd.f32 %v232_v16, %v231_v14  ;;  %v239_v19 = vrot.slane %v238_v17, 1 }
  0x26   : > { %v240_v20 = vadd.f32 %v239_v19, %v238_v17  ;;  %v242_v21 = vmul.f32 0.33333334, %v233_v18 }
  0x28   : > { %v243_v22 = vmul.f32 0.33333334, %v240_v20  ;;  %v244_v23 = vmul.f32 -20.0, %v242_v21 }
  0x2a   : > { %v245_v24 = vmul.f32 -20.0, %v243_v22  ;;  %v246_v25 = vmul.f32 1.442695, %v244_v23 }
  0x2c   : > { %411 = vpow2.f32 %v246_v25  ;;  %v248_v26 = vmul.f32 1.442695, %v245_v24 }
  0x2e   : > { %413 = vpow2.f32 %v248_v26 }
  0x36   : > { %v412_v32 = vpop.eup %411 }
  0x38   : > { %v414_v34 = vpop.eup %413 }
  0x39   : > { %v252_v35 = vcombine.low %v412_v32, %v414_v34 }
  0x3b   : > { %v259_v36 = vrot.slane %v252_v35, %v258_v33 }
  0x3d   : > { %v266_v37 = vrot.slane %v259_v36, %v258_v33 }
  0x3f   : > { %272 = vst.msk [vmem:[%s215_s23] sm:$0x3] %vm270_vm1, %v266_v37 }
  0x40 PF: > { %s12_s11 = sadd.s32 1, %s437_s11   ;;  %s498_s9 = smov %s433_s10 }
  0x41   : > { %p9_p5 = scmp.ge.s32.totalorder %s12_s11, 6   ;;  %s499_s10 = smov %s501_s12 }
  0x43   :  { %11 = sbr.rel (!%p9_p5) target bundleno = 2 (0x2), region = 61 }

// kernel: occlusion_loss_forward.6
= control target key start
LH: loop header
LB: loop body
LE: loop exit
PB: predicated region body
PF: predicated region fallthrough
CT: control target
= control target key end

     0   :  { %s367_s6 = smov 0   ;;  %s369_s7 = smov 0   ;;  %s404_s0 = inlined_call_operand.vmem [shape: f32[9,3,256], index: 0, kind: input, shape index: {}]   ;;  %s405_s1 = inlined_call_operand.vmem [shape: bf16[9,1,256], index: 1, kind: output, shape index: {}]  }
   0x1   :  { %s371_s8 = smov 0  }
   0x2 LB: > { %s23_s9 = sadd.s32 1, %s349_s7  ;;  %p294_p0 = scmp.ge.s32.totalorder %s353_s8, 1  ;;  %s353_s8 = sphi %s371_s8, %s11_s8   ;;  %s349_s7 = sphi %s369_s7, %s407_s7   ;;  %s345_s6 = sphi %s367_s6, %s406_s6  }
   0x3   : > { %p25_p1 = scmp.ge.s32.totalorder %s23_s9, 9  ;;  %p108_p2 = scmp.lt.s32.totalorder %s353_s8, 10 }
   0x5   : > { %s409_s9 = smov (%p25_p1, %s23_s9), 0  ;;  %p109_p3 = pnand %p294_p0, %p108_p2 }
   0x6   : > { %p136_p4 = scmp.lt.s32.totalorder (!%p109_p3), %s345_s6, 8  ;;  %vm158_vm0 = vcmask (!%p109_p3), 1042432   ;;  %v355_v11 = vmov (!%p109_p3), 1966171168   ;;  %v187_v13 = vlaneseq (!%p109_p3)  ;;  %vm199_vm2 = vcmask (!%p109_p3), 1040384  }
   0x7   : > { %112 = sbr.rel (%p109_p3) target bundleno = 43 (0x2b), region = 24  ;;  %v185_v12 = vunpack.c.l.s4 (!%p109_p3), %v355_v11  ;;  %vm200_vm3 = vsmask.f32 (!%p109_p3), 256  ;;  %v356_v21 = vmov (!%p109_p3), 0.0   ;;  %vm202_vm4 = vcmask (!%p109_p3), 1041409  }
   0x8   : > { %v188_v19 = vshrl.u32 (!%p109_p3), %v187_v13, 7  ;;  %vm203_vm5 = vsmask.f32 (!%p109_p3), 1280  ;;  %vm201_vm7 = vmand (!%p109_p3), %vm199_vm2, %vm200_vm3 }
   0x9   : > { %v186_v18 = vunpack.c.0.s8 (!%p109_p3), %v185_v12  ;;  %vm204_vm8 = vmand (!%p109_p3), %vm202_vm4, %vm203_vm5 }
   0xa   : > { %vm205_vm9 = vmor (!%p109_p3), %vm204_vm8, %vm201_vm7 }
   0xb   : > { %v189_v23 = vsub.s32 (!%p109_p3), %v186_v18, %v188_v19 }
   0xe   : > { %s411_s6 = smov (!%p136_p4, %s345_s6), 8 }
   0xf   : > { %s303_s10 = sshll.u32 %s411_s6, 3  ;;  %s297_s14 = sshll.u32 %s411_s6, 1 }
  0x10   : > { %s143_s13 = scalar_lea.vmem %s404_s0, %s303_s10  ;;  %s152_s17 = scalar_lea.vmem %s405_s1, %s297_s14 }
  0x11   : > { %v154_v0 = vld [vmem:[%s143_s13] sm:$0x77] }
  0x12   : > { %v156_v1 = vcombine.high %v154_v0, %v154_v0  ;;  %v159_v2 = vsel %vm158_vm0, %v154_v0, -inf  ;;  %v206_v27 = vld [vmem:[%s152_s17] sm:$0x3] }
  0x13   : > { %v160_v3 = vrot.slane %v159_v2, 4 }
  0x14   : > { %v166_v4 = vsel %vm158_vm0, %v156_v1, -inf }
  0x15   : > { %v161_v5 = vmax.f32 %v159_v2, %v160_v3  ;;  %v167_v6 = vrot.slane %v166_v4, 4 }
  0x17   : > { %v162_v7 = vrot.slane %v161_v5, 2  ;;  %v168_v8 = vmax.f32 %v166_v4, %v167_v6 }
  0x19   : > { %v163_v9 = vmax.f32 %v161_v5, %v162_v7  ;;  %v169_v10 = vrot.slane %v168_v8, 2 }
  0x1b   : > { %v164_v14 = vrot.slane %v163_v9, 1  ;;  %v170_v15 = vmax.f32 %v168_v8, %v169_v10 }
  0x1d   : > { %v165_v16 = vmax.f32 %v163_v9, %v164_v14  ;;  %v171_v17 = vrot.slane %v170_v15, 1 }
  0x1f   : > { %v172_v20 = vmax.f32 %v170_v15, %v171_v17  ;;  %vm173_vm1 = vcmp.eq.f32.partialorder %v165_v16, 0.0 }
  0x20   : > { %v298_v22 = vsel %vm173_vm1, 1.0, %v356_v21 }
  0x21   : > { %vm174_vm6 = vcmp.eq.f32.partialorder %v172_v20, 0.0 }
  0x22   : > { %v299_v24 = vsel %vm174_vm6, 1.0, %v356_v21 }
  0x23   : > { %v300_v25 = vpack.c.bf16 %v299_v24, %v298_v22 }
  0x25   : > { %v190_v26 = vrot.slane %v300_v25, %v189_v23 }
  0x27   : > { %v197_v28 = vrot.slane %v190_v26, %v189_v23 }
  0x29   : > { %v207_v29 = vsel %vm205_vm9, %v197_v28, %v206_v27 }
  0x2a   : > { %208 = vst [vmem:[%s152_s17] sm:$0x3] %v207_v29 }
  0x2b PF: > { %s11_s8 = sadd.s32 1, %s353_s8   ;;  %s406_s6 = smov %s349_s7 }
  0x2c   : > { %p8_p5 = scmp.ge.s32.totalorder %s11_s8, 11   ;;  %s407_s7 = smov %s409_s9 }
  0x2e   :  { %10 = sbr.rel (!%p8_p5) target bundleno = 2 (0x2), region = 54 }

// kernel: occlusion_loss_forward.9
= control target key start
LH: loop header
LB: loop body
LE: loop exit
PB: predicated region body
PF: predicated region fallthrough
CT: control target
= control target key end

     0   :  { %9 = vsyncpa [#allocation5], 0  ;;  %s680_s15 = smov 0   ;;  %s682_s16 = smov 0   ;;  %s745_s0 = inlined_call_operand.vmem [shape: bf16[4,3,256], index: 0, kind: input, shape index: {}]   ;;  %s746_s1 = inlined_call_operand.vmem [shape: bf16[4,3,256], index: 1, kind: input, shape index: {}]   ;;  %s747_s2 = inlined_call_operand.vmem [shape: bf16[4,3,256], index: 2, kind: input, shape index: {}]   ;;  %s748_s3 = inlined_call_operand.vmem [shape: bf16[4,1,256], index: 3, kind: input, shape index: {}]   ;;  %s749_s4 = inlined_call_operand.vmem [shape: f32[2], index: 4, kind: output, shape index: {}]  }
   0x1   :  { %s684_s17 = smov 0  }
   0x2 LB: > { %s547_s18 = sadd.s32 4294967295, %s650_s17   ;;  %s27_s19 = sadd.s32 1, %s646_s16  ;;  %s650_s17 = sphi %s684_s17, %s15_s17   ;;  %s646_s16 = sphi %s682_s16, %s752_s16   ;;  %s642_s15 = sphi %s680_s15, %s751_s15  }
   0x3   : > { %p29_p0 = scmp.ge.s32.totalorder %s27_s19, 4  ;;  %p550_p1 = scmp.ge.s32.totalorder %s650_s17, 1 }
   0x4   : > { %p227_p2 = scmp.lt.s32.totalorder %s650_s17, 5 }
   0x5   : > { %s754_s19 = smov (%p29_p0, %s27_s19), 0 }
   0x6   : > { %p228_p3 = pnand %p550_p1, %p227_p2 }
   0x7   : > { %p279_p4 = scmp.lt.s32.totalorder (!%p228_p3), %s642_s15, 3  ;;  %p317_p5 = scmp.eq.s32.totalorder (!%p228_p3), %s642_s15, 0 }
   0x8   : > { %231 = sbr.rel (%p228_p3) target bundleno = 282 (0x11a), region = 36  ;;  %p321_p6 = scmp.eq.s32.totalorder (!%p228_p3), %s642_s15, 3 }
   0xf   : > { %s280_s20 = scalar_select %p279_p4, %s642_s15, 3 }
  0x10   : > { %325 = sbr.rel (!%p317_p5) target bundleno = 23 (0x17), region = 40  ;;  %v652_v0 = vmov (%p317_p5), 0.0  }
  0x11   : > { %s566_s21 = sshll.u32 %s280_s20, 2  ;;  %s557_s22 = sshll.u32 %s280_s20, 1  ;;  %326 = vst [vmem:[#allocation2] sm:$0x77] (%p317_p5), %v652_v0  ;;  %327 = vst [vmem:[#allocation3] sm:$0x77] (%p317_p5), %v652_v0 }
  0x12   : > { %s286_s25 = scalar_lea.vmem %s745_s0, %s566_s21  ;;  %s296_s28 = scalar_lea.vmem %s746_s1, %s566_s21 }
  0x13   : > { %s306_s5 = scalar_lea.vmem %s747_s2, %s566_s21  ;;  %s315_s8 = scalar_lea.vmem %s748_s3, %s557_s22 }
  0x17 PF: > { %v328_v1 = vld [vmem:[%s286_s25] sm:$0xf]  ;;  %v340_v4 = vlaneseq  ;;  %v653_v13 = vmov 0.0   ;;  %vm401_vm2 = vcmask (%p321_p6), 1042432  }
  0x18   : > { %v330_v2 = vld [vmem:[%s296_s28] sm:$0xf]  ;;  %v329_v5 = vunpack.c.l.bf16 %v328_v1  ;;  %v388_v32 = vld [vmem:[#allocation3] sm:$0x77]  ;;  %v371_v36 = vld [vmem:[#allocation2] sm:$0x77] }
  0x19   : > { %v332_v3 = vld [vmem:[%s306_s5] sm:$0xf]  ;;  %v331_v6 = vunpack.c.l.bf16 %v330_v2  ;;  %v341_v10 = vshrl.u32 %v340_v4, 7 }
  0x1a   : > { %v333_v7 = vunpack.c.l.bf16 %v332_v3  ;;  %v334_v8 = vld [vmem:[%s315_s8] sm:$0x3] }
  0x1b   : > { %v335_v9 = vunpack.c.l.bf16 %v334_v8  ;;  %vm336_vm0 = vcmp.gt.f32.partialorder %v331_v6, 0.0  ;;  %v372_v11 = vsub.f32 %v329_v5, %v331_v6  ;;  %v342_v15 = vsub.s32 0, %v341_v10 }
  0x1c   : > { %vm363_vm1 = vcmp.gt.f32.partialorder %v333_v7, 0.0  ;;  %v374_v12 = vsub.f32 %v329_v5, %v333_v7  ;;  %v560_v14 = vsel %vm336_vm0, 1.0, %v653_v13  ;;  %v346_v16 = vsub.s32 2, %v341_v10 }
  0x1d   : > { %v561_v17 = vsel %vm363_vm1, 1.0, %v653_v13  ;;  %v373_v18 = vand.u32 2147483647, %v372_v11  ;;  %v343_v20 = vrot.slane %v335_v9, %v342_v15  ;;  %v359_v22 = vcombine.high %v560_v14, %v560_v14 }
  0x1e   : > { %v375_v19 = vand.u32 2147483647, %v374_v12  ;;  %v347_v21 = vrot.slane %v335_v9, %v346_v16  ;;  %v367_v26 = vcombine.high %v561_v17, %v561_v17 }
  0x1f   : > { %v353_v24 = vrot.slane %v343_v20, %v342_v15 }
  0x20   : > { %v376_v23 = vadd.f32 %v375_v19, %v373_v18  ;;  %v357_v25 = vrot.slane %v347_v21, %v342_v15 }
  0x21   : > { %v361_v27 = vmul.f32 %v560_v14, %v353_v24 }
  0x22   : > { %v362_v28 = vmul.f32 %v359_v22, %v357_v25  ;;  %v378_v29 = vcombine.high %v376_v23, %v376_v23 }
  0x23   : > { %v369_v30 = vmul.f32 %v561_v17, %v361_v27 }
  0x24   : > { %v370_v31 = vmul.f32 %v367_v26, %v362_v28 }
  0x25   : > { %v380_v33 = vmul.f32 %v376_v23, %v369_v30 }
  0x26   : > { %v381_v34 = vmul.f32 %v378_v29, %v370_v31  ;;  %v391_v35 = vcombine.low %v369_v30, %v370_v31  ;;  %396 = sbr.rel (!%p321_p6) target bundleno = 266 (0x10a), region = 44 }
  0x28   : > { %v384_v37 = vcombine.low %v380_v33, %v381_v34  ;;  %v393_v38 = vadd.f32 %v391_v35, %v388_v32 }
  0x2a   : > { %v386_v39 = vadd.f32 %v384_v37, %v371_v36  ;;  %394 = vst [vmem:[#allocation3] sm:$0x77] %v393_v38 }
  0x2c   : > { %387 = vst [vmem:[#allocation2] sm:$0x77] %v386_v39 }
  0x31   : > { %v416_v41 = vld [vmem:[#allocation3] sm:$0x77] }
  0x32   : > { %v418_v44 = vcombine.high %v416_v41, %v416_v41  ;;  %v420_v46 = vsel %vm401_vm2, %v416_v41, 0.0 }
  0x33   : > { %v397_v40 = vld [vmem:[#allocation2] sm:$0x77] }
  0x34   : > { %v399_v42 = vcombine.high %v397_v40, %v397_v40  ;;  %v402_v43 = vsel %vm401_vm2, %v397_v40, 0.0  ;;  %v421_v47 = vsel %vm401_vm2, %v418_v44, 0.0 }
  0x35   : > { %v422_v49 = vadd.f32 %v421_v47, %v420_v46 }
  0x36   : > { %v403_v45 = vsel %vm401_vm2, %v399_v42, 0.0 }
  0x37   : > { %v404_v48 = vadd.f32 %v403_v45, %v402_v43 }
  0x39   : > { %405 = vadd.xlane.f32.xlu0 %v404_v48 }
  0x3d   : > { %423 = vadd.xlane.f32.xlu0 %v422_v49 }
  0xc6   : > { %v406_v50 = vpop.xlane.xlu0 %405 }
  0xc7   : > { %v407_v51 = vrot.slane %v406_v50, 4 }
  0xc9   : > { %v408_v52 = vadd.f32 %v407_v51, %v406_v50 }
  0xca   : > { %v424_v53 = vpop.xlane.xlu0 %423 }
  0xcb   : > { %v409_v54 = vrot.slane %v408_v52, 2  ;;  %v425_v55 = vrot.slane %v424_v53, 4 }
  0xcd   : > { %v426_v56 = vadd.f32 %v425_v55, %v424_v53  ;;  %v410_v57 = vadd.f32 %v409_v54, %v408_v52 }
  0xcf   : > { %v427_v58 = vrot.slane %v426_v56, 2  ;;  %v411_v59 = vrot.slane %v410_v57, 1 }
  0xd1   : > { %v428_v60 = vadd.f32 %v427_v58, %v426_v56  ;;  %v412_v61 = vadd.f32 %v411_v59, %v410_v57 }
  0xd3   : > { %571 = vpush %v412_v61  ;;  %v429_v62 = vrot.slane %v428_v60, 1 }
  0xd5   : > { %v430_v63 = vadd.f32 %v429_v62, %v428_v60 }
  0xd7   : > { %573 = vpush %v430_v63 }
 0x104   : > { %s572_s9 = spop %571 }
 0x105   : > { %415 = sst [smem:[#allocation4]] %s572_s9 }
 0x108   : > { %s574_s10 = spop %573 }
 0x109   : > { %433 = sst [smem:[#allocation4 + $0x1]] %s574_s10 }
 0x10a PF: > { %p721_p7 = scmp.eq.s32.totalorder %s547_s18, 3  ;;  %s441_s14 = sshll.u32 %s749_s4, 4  ;;  %s442_s14 = int_to_ptr.vmem [resolvable:$true] %s441_s14 }
 0x10b   : > { %s610_s15 = scalar_lea.vmem %s442_s14, 16  ;;  %p617_p11 = scmp.lt.s32.totalorder %s442_s14, %s442_s14 }
 0x10c   : > { %p611_p8 = scmp.ne.s32.totalorder %s442_s14, %s610_s15  ;;  %p618_p12 = scmp.lt.s32.totalorder %s610_s15, %s610_s15 }
 0x10e   : > { %p612_p9 = pnand %p611_p8, %p721_p7  ;;  %p619_p13 = por %p618_p12, %p617_p11 }
 0x110   : > { %p613_p10 = pneg %p612_p9 }
 0x112   : > { %p620_p0 = pnand %p619_p13, %p613_p10 }
 0x114   : > { %623 = shalt.err (!%p620_p0)
}
 0x115   : > { %s654_s18 = smov [#allocation4]  }
 0x116   : > { %576 = dma.smem_to_vmem (%p721_p7), %s654_s18, 16, %s442_s14, [#allocation5]  }
 0x117   : > { %637 = dma.done.wait (%p721_p7), [#allocation5], 16  }
 0x118   : > { %639 = vsyncadd (%p721_p7), [#allocation5], 4294967280 }
 0x119   : > { %449 = sfence }
 0x11a PF: > { %s15_s17 = sadd.s32 1, %s650_s17   ;;  %s751_s15 = smov %s646_s16 }
 0x11b   : > { %p12_p1 = scmp.ge.s32.totalorder %s15_s17, 6   ;;  %s752_s16 = smov %s754_s19 }
 0x11d   :  { %14 = sbr.rel (!%p12_p1) target bundleno = 2 (0x2), region = 82 }
 0x124   :  { %455 = vsyncpa [#allocation5], 1 }
 0x125   :  { %457 = vsyncpa [#allocation5 + $0x1], 1 }

</bundles_post_ra>
